<compile_context>
chip_gen: v7x
topology: tpu7x:2x2x1
jax: 0.10.0
libtpu: 0.0.40
codegen_flags: <defaults>
</compile_context>

<pallas_src>
import jax
import jax.numpy as jnp
from jax.experimental import pallas as pl
from jax.experimental.pallas import tpu as pltpu


def _round_up(x, m):
    return ((x + m - 1) // m) * m


# Single-buffer constant-index weight blocks when the API is available.
_CONST_BLOCK = {"pipeline_mode": pl.Buffered(1)} if hasattr(pl, "Buffered") else {}


def _encoder_kernel(x_ref, w1_ref, b1_ref, wp_ref, bp_ref, out_ref):
    # h = ReLU(x @ W1 + b1) -- recomputed each grid step (cheap K=128 matmul,
    # hidden under the Wp / output DMA streams; no scratch carry needed).
    h = jnp.dot(x_ref[...], w1_ref[...], preferred_element_type=jnp.float32)
    h = jnp.maximum(h + b1_ref[...], 0.0).astype(jnp.bfloat16)
    # Fused (Linear2 o projection):  hd = tanh(h @ (W2 @ P) + b2 @ P)
    acc = jnp.dot(h, wp_ref[...], preferred_element_type=jnp.float32)
    out_ref[...] = jnp.tanh(acc + bp_ref[...]).astype(out_ref.dtype)


def prepare_encoder_params(w1, b1, w2, b2, proj, *, hd_tile=2048):
    """One-time parameter preparation (run once, cache the result).

    Folds Linear2 into the random projection (exact: ReLU precedes W2),
    casts MXU operands to bf16, and zero-pads to MXU/lane-friendly shapes.
    """
    assert hd_tile % 128 == 0
    D_in, H = w1.shape
    HD = proj.shape[1]

    # Algebraic fusion (f32): Wp = W2 @ P  [H, HD],  bp = b2 @ P  [1, HD].
    wp = w2.astype(jnp.float32) @ proj.astype(jnp.float32)
    bp = (b2.astype(jnp.float32) @ proj.astype(jnp.float32)).reshape(1, HD)

    D_pad = _round_up(D_in, 128)
    ht = min(hd_tile, _round_up(HD, 128))
    HD_pad = _round_up(HD, ht)

    w1_p = jnp.zeros((D_pad, H), jnp.bfloat16).at[:D_in, :].set(
        w1.astype(jnp.bfloat16))
    b1_f = b1.astype(jnp.float32).reshape(1, H)
    wp_p = jnp.zeros((H, HD_pad), jnp.bfloat16).at[:, :HD].set(
        wp.astype(jnp.bfloat16))
    bp_p = jnp.zeros((1, HD_pad), jnp.float32).at[:, :HD].set(bp)

    return dict(w1_p=w1_p, b1_f=b1_f, wp_p=wp_p, bp_p=bp_p,
                D_in=D_in, D_pad=D_pad, H=H, HD=HD, HD_pad=HD_pad, ht=ht)


def neural_hdc_encode(x, params, *, batch_tile=128, out_dtype=jnp.bfloat16):
    """x: [B, D_in] -> hd_vector: [B, HD]  (bf16 output by default)."""
    B, D_in = x.shape
    assert D_in == params["D_in"]
    D_pad, H = params["D_pad"], params["H"]
    HD, HD_pad, ht = params["HD"], params["HD_pad"], params["ht"]

    bt = min(batch_tile, _round_up(B, 8))
    B_pad = _round_up(B, bt)

    # Per-call work on x only (small): pad + bf16 cast.
    x_p = jnp.zeros((B_pad, D_pad), jnp.bfloat16).at[:B, :D_in].set(
        x.astype(jnp.bfloat16))

    n_hd = HD_pad // ht
    n_b = B_pad // bt
    grid = (n_hd, n_b)  # HD outer, batch inner -> Wp streamed from HBM once.

    out_bytes = jnp.dtype(out_dtype).itemsize

    # Explicit VMEM budget: double-buffered streamed blocks + constants,
    # with headroom.  Covers v5e's 16 MiB scoped default; capped for v7x's
    # 64 MiB physical VMEM.
    per_buf = (bt * D_pad * 2 + D_pad * H * 2 + H * 4
               + H * ht * 2 + ht * 4 + bt * ht * out_bytes)
    vmem_limit = int(min(64 << 20, max(32 << 20, 3 * per_buf)))

    cost = pl.CostEstimate(
        flops=int(2 * B_pad * D_pad * H * n_hd + 2 * B_pad * H * HD_pad),
        transcendentals=int(B_pad * HD_pad),
        bytes_accessed=int(
            n_hd * B_pad * D_pad * 2          # x re-read once per HD tile
            + D_pad * H * 2 + H * 4           # W1 / b1 (constant, read once)
            + H * HD_pad * 2 + HD_pad * 4     # fused Wp / bp (read once)
            + B_pad * HD_pad * out_bytes),    # output store
    )

    out = pl.pallas_call(
        _encoder_kernel,
        out_shape=jax.ShapeDtypeStruct((B_pad, HD_pad), out_dtype),
        grid_spec=pltpu.PrefetchScalarGridSpec(
            num_scalar_prefetch=0,
            grid=grid,
            in_specs=[
                pl.BlockSpec((bt, D_pad), lambda j, b: (b, 0)),              # x
                pl.BlockSpec((D_pad, H), lambda j, b: (0, 0), **_CONST_BLOCK),  # W1
                pl.BlockSpec((1, H), lambda j, b: (0, 0), **_CONST_BLOCK),      # b1
                pl.BlockSpec((H, ht), lambda j, b: (0, j)),                  # Wp tile
                pl.BlockSpec((1, ht), lambda j, b: (0, j)),                  # bp tile
            ],
            out_specs=pl.BlockSpec((bt, ht), lambda j, b: (b, j)),
        ),
        compiler_params=pltpu.CompilerParams(
            dimension_semantics=("parallel", "parallel"),
            vmem_limit_bytes=vmem_limit,
        ),
        cost_estimate=cost,
    )(x_p, params["w1_p"], params["b1_f"], params["wp_p"], params["bp_p"])

    return out[:B, :HD]


def make_params(key, input_dim, hidden_dim, hd_dim):
    """Deterministic parameter init mirroring the module's __init__ shapes."""
    k1, k2, k3, k4, k5 = jax.random.split(key, 5)

    lim1 = 1.0 / jnp.sqrt(input_dim)
    w1 = jax.random.uniform(k1, (input_dim, hidden_dim), jnp.float32, -lim1, lim1)
    b1 = jax.random.uniform(k2, (1, hidden_dim), jnp.float32, -lim1, lim1)

    lim2 = 1.0 / jnp.sqrt(hidden_dim)
    w2 = jax.random.uniform(k3, (hidden_dim, input_dim), jnp.float32, -lim2, lim2)
    b2 = jax.random.uniform(k4, (1, input_dim), jnp.float32, -lim2, lim2)

    proj = jax.random.normal(k5, (input_dim, hd_dim), jnp.float32) / jnp.sqrt(input_dim)
    proj = proj / jnp.linalg.norm(proj, axis=0, keepdims=True)

    return w1, b1, w2, b2, proj


def reference_forward(x, w1, b1, w2, b2, proj):
    """Pure-f32, unfused module semantics."""
    h = jnp.maximum(x @ w1 + b1, 0.0)
    e = h @ w2 + b2
    return jnp.tanh(e @ proj)


def reference_forward_bf16(x, w1, b1, w2, b2, proj):
    """Reference mirroring the kernel arithmetic (fused Wp, bf16 MXU operands,
    f32 accumulation, f32 tanh)."""
    wp = w2 @ proj
    bp = b2 @ proj
    h = jnp.dot(x.astype(jnp.bfloat16), w1.astype(jnp.bfloat16),
                preferred_element_type=jnp.float32) + b1
    h = jnp.maximum(h, 0.0).astype(jnp.bfloat16)
    acc = jnp.dot(h, wp.astype(jnp.bfloat16),
                  preferred_element_type=jnp.float32) + bp
    return jnp.tanh(acc)


if __name__ == "__main__":
    # Small shapes consistent with the module (input_dim=88, hidden=128,
    # hd_dim scaled down from 10000 -> 2000; batch=16).
    B, D_IN, HID, HD = 16, 88, 128, 2000

    key = jax.random.PRNGKey(0)
    k_x, k_p = jax.random.split(key)

    x = jax.random.normal(k_x, (B, D_IN), jnp.float32)
    w1, b1, w2, b2, proj = make_params(k_p, D_IN, HID, HD)

    # One-time prep (hoisted out of the hot path).  hd_tile=1024 -> 2 HD tiles
    # here, exercising the multi-tile path (and v7x's second TC).
    params = prepare_encoder_params(w1, b1, w2, b2, proj, hd_tile=1024)

    out = neural_hdc_encode(x, params)            # bf16 output
    out = jax.block_until_ready(out)
    assert out.shape == (B, HD)
    out_f32 = out.astype(jnp.float32)

    # Primary check: same arithmetic path (fused weights, bf16 MXU operands);
    # tolerance accounts for the bf16 output cast (tanh in [-1, 1]).
    ref_b = reference_forward_bf16(x, w1, b1, w2, b2, proj)
    assert bool(jnp.allclose(out_f32, ref_b, atol=2e-2, rtol=2e-2)), \
        "mismatch vs bf16-path reference"

    # Sanity check: still matches the original unfused f32 module semantics
    # up to bf16 matmul / output precision.
    ref_f = reference_forward(x, w1, b1, w2, b2, proj)
    assert float(jnp.max(jnp.abs(out_f32 - ref_f))) < 6e-2, \
        "mismatch vs f32 module semantics"

    print("KERNEL_OK")
</pallas_src>

<mosaic_0001>
module attributes {stable_mosaic.version = 11 : i64} {
  func.func @_encoder_kernel(%arg0: i32, %arg1: i32, %arg2: memref<16x128xbf16, #tpu.memory_space<vmem>>, %arg3: memref<128x128xbf16, #tpu.memory_space<vmem>>, %arg4: memref<1x128xf32, #tpu.memory_space<vmem>>, %arg5: memref<128x1024xbf16, #tpu.memory_space<vmem>>, %arg6: memref<1x1024xf32, #tpu.memory_space<vmem>>, %arg7: memref<16x1024xbf16, #tpu.memory_space<vmem>>) attributes {dimension_semantics = [#tpu.dimension_semantics<parallel>, #tpu.dimension_semantics<parallel>], iteration_bounds = array<i64: 2, 1>, scalar_prefetch = 0 : i64, scratch_operands = 0 : i64, tpu.core_type = #tpu.core_type<tc>, window_params = [{transform_indices = @transform_0, window_bounds = array<i64: 16, 128>}, {pipeline_mode = #tpu.pipeline_mode<synchronous>, transform_indices = @transform_1, window_bounds = array<i64: 128, 128>}, {pipeline_mode = #tpu.pipeline_mode<synchronous>, transform_indices = @transform_2, window_bounds = array<i64: 1, 128>}, {transform_indices = @transform_3, window_bounds = array<i64: 128, 1024>}, {transform_indices = @transform_4, window_bounds = array<i64: 1, 1024>}, {transform_indices = @transform_5, window_bounds = array<i64: 16, 1024>}]} {
    %c0 = arith.constant 0 : index
    %c0_0 = arith.constant 0 : index
    %0 = vector.load %arg2[%c0, %c0_0] : memref<16x128xbf16, #tpu.memory_space<vmem>>, vector<16x128xbf16>
    %c0_1 = arith.constant 0 : index
    %c0_2 = arith.constant 0 : index
    %1 = vector.load %arg3[%c0_1, %c0_2] : memref<128x128xbf16, #tpu.memory_space<vmem>>, vector<128x128xbf16>
    %cst = arith.constant dense<0.000000e+00> : vector<16x128xf32>
    %2 = tpu.matmul %0, %1, %cst {dimension_numbers = #tpu.dot_dimension_numbers<[1], [0], [0], [1], [0, 0, 1, 1], [], []>} : vector<16x128xbf16>, vector<128x128xbf16>, vector<16x128xf32> -> vector<16x128xf32>
    %c0_3 = arith.constant 0 : index
    %c0_4 = arith.constant 0 : index
    %3 = vector.load %arg4[%c0_3, %c0_4] : memref<1x128xf32, #tpu.memory_space<vmem>>, vector<1x128xf32>
    %4 = vector.broadcast %3 : vector<1x128xf32> to vector<16x128xf32>
    %5 = arith.addf %2, %4 : vector<16x128xf32>
    %cst_5 = arith.constant 0.000000e+00 : f32
    %6 = vector.broadcast %cst_5 : f32 to vector<16x128xf32>
    %7 = arith.maximumf %5, %6 : vector<16x128xf32>
    %8 = arith.truncf %7 : vector<16x128xf32> to vector<16x128xbf16>
    %c0_6 = arith.constant 0 : index
    %c0_7 = arith.constant 0 : index
    %9 = vector.load %arg5[%c0_6, %c0_7] : memref<128x1024xbf16, #tpu.memory_space<vmem>>, vector<128x1024xbf16>
    %cst_8 = arith.constant dense<0.000000e+00> : vector<16x1024xf32>
    %10 = tpu.matmul %8, %9, %cst_8 {dimension_numbers = #tpu.dot_dimension_numbers<[1], [0], [0], [1], [0, 0, 1, 1], [], []>} : vector<16x128xbf16>, vector<128x1024xbf16>, vector<16x1024xf32> -> vector<16x1024xf32>
    %c0_9 = arith.constant 0 : index
    %c0_10 = arith.constant 0 : index
    %11 = vector.load %arg6[%c0_9, %c0_10] : memref<1x1024xf32, #tpu.memory_space<vmem>>, vector<1x1024xf32>
    %12 = vector.broadcast %11 : vector<1x1024xf32> to vector<16x1024xf32>
    %13 = arith.addf %10, %12 : vector<16x1024xf32>
    %14 = math.tanh %13 : vector<16x1024xf32>
    %15 = arith.truncf %14 : vector<16x1024xf32> to vector<16x1024xbf16>
    %c0_11 = arith.constant 0 : index
    %c0_12 = arith.constant 0 : index
    %16 = vector.load %arg7[%c0_11, %c0_12] : memref<16x1024xbf16, #tpu.memory_space<vmem>>, vector<16x1024xbf16>
    tpu.vector_store %arg7[%c0_11, %c0_12], %15 {strides = array<i32>} : memref<16x1024xbf16, #tpu.memory_space<vmem>>, vector<16x1024xbf16>,
    return
  }
  func.func @transform_0(%arg0: i32, %arg1: i32) -> (i32, i32) {
    %c0_i32 = arith.constant 0 : i32
    %c0_i32_0 = arith.constant 0 : i32
    return %arg1, %c0_i32 : i32, i32
  }
  func.func @transform_1(%arg0: i32, %arg1: i32) -> (i32, i32) {
    %c0_i32 = arith.constant 0 : i32
    %c0_i32_0 = arith.constant 0 : i32
    %c0_i32_1 = arith.constant 0 : i32
    return %c0_i32, %c0_i32_0 : i32, i32
  }
  func.func @transform_2(%arg0: i32, %arg1: i32) -> (i32, i32) {
    %c0_i32 = arith.constant 0 : i32
    %c0_i32_0 = arith.constant 0 : i32
    %c0_i32_1 = arith.constant 0 : i32
    return %c0_i32, %c0_i32_0 : i32, i32
  }
  func.func @transform_3(%arg0: i32, %arg1: i32) -> (i32, i32) {
    %c0_i32 = arith.constant 0 : i32
    %c0_i32_0 = arith.constant 0 : i32
    return %c0_i32, %arg0 : i32, i32
  }
  func.func @transform_4(%arg0: i32, %arg1: i32) -> (i32, i32) {
    %c0_i32 = arith.constant 0 : i32
    %c0_i32_0 = arith.constant 0 : i32
    return %c0_i32, %arg0 : i32, i32
  }
  func.func @transform_5(%arg0: i32, %arg1: i32) -> (i32, i32) {
    %c0_i32 = arith.constant 0 : i32
    return %arg1, %arg0 : i32, i32
  }
}

</mosaic_0001>

<bundles_post_ra>
// kernel: tpu_custom_call.1
= control target key start
LH: loop header
LB: loop body
LE: loop exit
PB: predicated region body
PF: predicated region fallthrough
CT: control target
= control target key end

     0   :  { %s2183_s0 = inlined_call_operand.hbm [shape: bf16[16,128], index: 0, kind: input, shape index: {}]   ;;  %s2184_s1 = inlined_call_operand.hbm [shape: bf16[128,128], index: 1, kind: input, shape index: {}]   ;;  %s2185_s2 = inlined_call_operand.vmem [shape: f32[1,128], index: 2, kind: input, shape index: {}]   ;;  %s2186_s3 = inlined_call_operand.hbm [shape: bf16[128,2048], index: 3, kind: input, shape index: {}]   ;;  %s2187_s4 = inlined_call_operand.hbm [shape: f32[1,2048], index: 4, kind: input, shape index: {}]   ;;  %s2188_s5 = inlined_call_operand.hbm [shape: bf16[16,2048], index: 5, kind: output, shape index: {}]  }
   0x1   :  { %2205 = sst [smem:[#allocation18_spill]] %s2183_s0 }
   0x2   :  { %2206 = sst [smem:[#allocation19_spill]] %s2186_s3 }
   0x3   :  { %2207 = sst [smem:[#allocation20_spill]] %s2188_s5 }
   0x4   :  { %10 = vsyncpa [#allocation3], 0 }
   0x5   :  { %11 = vsyncpa [#allocation6], 0 }
   0x6   :  { %12 = vsyncpa [#allocation4], 0 }
   0x7   :  { %14 = vsyncpa [#allocation4 + $0x1], 0  ;;  %s1807_s18 = smov 0   ;;  %s1809_s19 = smov 0  }
   0x8   :  { %s1811_s20 = smov 0   ;;  %s1813_s21 = smov 0  }
   0x9   :  { %s1815_s22 = smov 0   ;;  %s1817_s23 = smov 0  }
   0xa LB: > { %2208 = sst [smem:[#allocation14_spill]] %s1739_s18  ;;  %s1838_s24 = sadd.s32 4294967295, %s1759_s23   ;;  %s1759_s23 = sphi %s1817_s23, %s20_s23   ;;  %s1755_s22 = sphi %s1815_s22, %s2249_s22   ;;  %s1751_s21 = sphi %s1813_s21, %s2248_s21   ;;  %s1747_s20 = sphi %s1811_s20, %s2247_s20   ;;  %s1743_s19 = sphi %s1809_s19, %s2246_s19   ;;  %s1739_s18 = sphi %s1807_s18, %s2245_s18  }
   0xb   : > { %s1269_s25 = sadd.s32 4294967294, %s1759_s23   ;;  %p114_p0 = scmp.ne.s32.totalorder %s1747_s20, %s1743_s19 }
   0xc   : > { %p115_p1 = scmp.eq.s32.totalorder %s1759_s23, 0  ;;  %p120_p2 = scmp.ne.s32.totalorder %s1743_s19, %s1739_s18 }
   0xd   : > { %p2189_p3 = scmp.eq.s32.totalorder %s1838_s24, 0  ;;  %p172_p4 = scmp.eq.s32.totalorder %s1838_s24, 1 }
   0xe   : > { %p1849_p5 = por %p115_p1, %p114_p0  ;;  %p178_p6 = scmp.eq.s32.totalorder %s1269_s25, 1 }
   0xf   : > { %p1855_p7 = por %p2189_p3, %p120_p2  ;;  %p1859_p8 = por %p172_p4, %p114_p0 }
  0x10   : > { %p1863_p9 = por %p178_p6, %p120_p2  ;;  %p1270_p10 = scmp.ge.s32.totalorder %s1759_s23, 1 }
  0x11   : > { %s2210_s28 = scalar_select %p1855_p7, 1, 0 }
  0x12   : > { %s2211_s29 = scalar_select %p1859_p8, 1, 0 }
  0x13   : > { %s2213_s30 = scalar_select %p1863_p9, 1, 0 }
  0x14   : > { %2212 = sst [smem:[#allocation15_spill]] %s2211_s29  ;;  %p185_p11 = scmp.lt.s32.totalorder %s1759_s23, 3 }
  0x15   : > { %2214 = sst [smem:[#allocation16_spill]] %s2213_s30  ;;  %s1761_s7 = smov [#allocation2]  }
  0x16   : > { %p1869_p12 = pnand %p1270_p10, %p185_p11  ;;  %s200_s8 = sshll.u32 %s1761_s7, 4  ;;  %s1873_s8 = int_to_ptr.vmem [resolvable:$true] %s200_s8 }
  0x17   : > { %p1447_p1 = scmp.lt.s32.totalorder %s1759_s23, 2  ;;  %s32_s11 = sadd.s32 1, %s1755_s22 }
  0x18   : > { %s2215_s6 = scalar_select %p1869_p12, 1, 0 }
  0x19   : > { %p1427_p13 = pneg %p1869_p12  ;;  %p1887_p4 = pnand %p1447_p1, %p1849_p5 }
  0x1a   : > { %p1892_p6 = scmp.ge.s32.totalorder %s32_s11, 2  ;;  %s2219_s0 = sld [smem:[#allocation18_spill]] }
  0x1b   : > { %p1881_p2 = pnand %p1427_p13, %p2189_p3 }
  0x1c   : > { %s2217_s10 = scalar_select %p1887_p4, 1, 0 }
  0x1d   : > { %p2198_p11 = pneg %p1881_p2 }
  0x20   : > { %s1553_s15 = scalar_lea.hbm %s2219_s0, 128 }
  0x21   : > { %p1554_p10 = scmp.ne.s32.totalorder %s2219_s0, %s1553_s15  ;;  %p1560_p1 = scmp.lt.u32.totalorder %s1553_s15, %s2219_s0 }
  0x23   : > { %p1556_p5 = pnand %p2198_p11, %p1554_p10 }
  0x25   : > { %p1557_p13 = pneg %p1556_p5 }
  0x27   : > { %p1562_p0 = pnand %p1560_p1, %p1557_p13 }
  0x29   : > { %1565 = shalt.err (!%p1562_p0)
}
  0x2a   : > { %s1566_s7 = scalar_lea.vmem %s1873_s8, 128  ;;  %p1574_p7 = scmp.lt.s32.totalorder %s1873_s8, %s1873_s8 }
  0x2b   : > { %p1567_p3 = scmp.ne.s32.totalorder %s1873_s8, %s1566_s7  ;;  %p1575_p10 = scmp.lt.s32.totalorder %s1566_s7, %s1566_s7 }
  0x2d   : > { %p1569_p9 = pnand %p1567_p3, %p2198_p11  ;;  %p1576_p5 = por %p1575_p10, %p1574_p7 }
  0x2f   : > { %p1570_p8 = pneg %p1569_p9 }
  0x31   : > { %p1577_p12 = pnand %p1576_p5, %p1570_p8 }
  0x33   : > { %1580 = shalt.err (!%p1577_p12)
}
  0x34   : > { %s2199_s13 = smov 64   ;;  %s2200_s14 = smov 4  }
  0x35   : > { %1430 = dma.hbm_to_vmem [thread:$0]  (!%p1881_p2), %s2219_s0, 128, %s1873_s8, [#allocation3], %s2199_s13, %s2199_s13, %s2200_s14  }
  0x36   : > { %s230_s17 = sand.u32 1, %s1759_s23   ;;  %s2251_s11 = smov (%p1892_p6, %s32_s11), 0 }
  0x37   : > { %2220 = sst [smem:[#allocation17_spill]] %s2251_s11  ;;  %s232_s25 = sand.u32 1, %s1747_s20  }
  0x38   : > { %s104_s27 = ssub.s32 %s1755_s22, %s2251_s11  ;;  %s1274_s7 = sshll.u32 %s232_s25, 9 }
  0x39   : > { %p105_p3 = scmp.eq.s32.totalorder %s104_s27, 0  ;;  %s1373_s26 = sshll.u32 %s1755_s22, 9 }
  0x3a   : > { %s234_s30 = scalar_lea.vmem [#allocation7], %s1274_s7  ;;  %s2221_s5 = sadd.s32 1, %s1747_s20 }
  0x3b   : > { %s241_s18 = sshll.u32 %s234_s30, 4  ;;  %s2222_s3 = sld [smem:[#allocation19_spill]]  ;;  %s1947_s18 = int_to_ptr.vmem [resolvable:$true] %s241_s18 }
  0x3c   : > { %s1940_s29 = scalar_select %p105_p3, %s1747_s20, %s2221_s5  }
  0x3d   : > { %s1949_s12 = scalar_lea.sflag [#allocation3], %s230_s17  ;;  %p2202_p8 = pneg %p1887_p4 }
  0x41   : > { %s1945_s16 = scalar_lea.hbm %s2222_s3, %s1373_s26  ;;  %s1586_s26 = scalar_lea.hbm %s2222_s3, 16384 }
  0x42   : > { %s1581_s27 = scalar_lea.hbm %s1945_s16, 8192  ;;  %p1587_p0 = scmp.lt.u32.totalorder %s1945_s16, %s2222_s3 }
  0x43   : > { %p1582_p7 = scmp.ne.s32.totalorder %s1945_s16, %s1581_s27  ;;  %p1588_p6 = scmp.lt.u32.totalorder %s1586_s26, %s1581_s27 }
  0x44   : > { %p1590_p1 = scmp.lt.u32.totalorder %s1581_s27, %s1945_s16 }
  0x45   : > { %p1584_p9 = pnand %p2202_p8, %p1582_p7  ;;  %p1589_p13 = por %p1588_p6, %p1587_p0 }
  0x47   : > { %p1585_p12 = pneg %p1584_p9  ;;  %p1591_p10 = por %p1590_p1, %p1589_p13 }
  0x49   : > { %p1592_p5 = pnand %p1591_p10, %p1585_p12 }
  0x4b   : > { %1595 = shalt.err (!%p1592_p5)
}
  0x4c   : > { %s1596_s17 = scalar_lea.vmem %s1947_s18, 8192  ;;  %s1764_s8 = smov [#allocation7]  }
  0x4d   : > { %p1597_p3 = scmp.ne.s32.totalorder %s1947_s18, %s1596_s17  ;;  %s1601_s5 = sshll.u32 %s1764_s8, 4  ;;  %s1602_s5 = int_to_ptr.vmem [resolvable:$false] %s1601_s5 }
  0x4e   : > { %s1603_s30 = scalar_lea.vmem %s1602_s5, 16384  ;;  %p1604_p11 = scmp.lt.s32.totalorder %s1947_s18, %s1602_s5 }
  0x4f   : > { %p1599_p7 = pnand %p1597_p3, %p2202_p8  ;;  %p1605_p0 = scmp.lt.s32.totalorder %s1603_s30, %s1596_s17 }
  0x51   : > { %p1600_p9 = pneg %p1599_p7  ;;  %p1606_p6 = por %p1605_p0, %p1604_p11 }
  0x53   : > { %p1607_p13 = pnand %p1606_p6, %p1600_p9 }
  0x55   : > { %1610 = shalt.err (!%p1607_p13)
}
  0x56   : > { %s1765_s27 = smov 1024   ;;  %s1766_s26 = smov 512  }
  0x57   : > { %s1767_s7 = smov 32   ;;  %s1768_s15 = smov [#allocation5]  }
  0x58   : > { %1437 = dma.hbm_to_vmem [thread:$0]  (!%p1887_p4), %s1945_s16, 8192, %s1947_s18, %s1949_s12, %s1765_s27, %s1766_s26, %s1767_s7  }
  0x59   : > { %s213_s8 = sshll.u32 %s1768_s15, 4  ;;  %s1277_s13 = sshll.u32 %s232_s25, 3  ;;  %s214_s8 = int_to_ptr.vmem [resolvable:$true] %s213_s8 }
  0x5a   : > { %s1611_s30 = scalar_lea.hbm %s2184_s1, 1024  ;;  %p2223_p12 = pneg %p1881_p2 }
  0x5b   : > { %p1612_p11 = scmp.ne.s32.totalorder %s2184_s1, %s1611_s30  ;;  %p1618_p5 = scmp.lt.u32.totalorder %s1611_s30, %s2184_s1 }
  0x5d   : > { %p1614_p1 = pnand %p1612_p11, %p2223_p12 }
  0x5f   : > { %p1615_p10 = pneg %p1614_p1 }
  0x61   : > { %p1620_p3 = pnand %p1618_p5, %p1615_p10 }
  0x63   : > { %1623 = shalt.err (!%p1620_p3)
}
  0x64   : > { %s1624_s18 = scalar_lea.vmem %s214_s8, 1024  ;;  %p2224_p9 = pmov %p2223_p12 }
  0x65   : > { %p1625_p7 = scmp.ne.s32.totalorder %s214_s8, %s1624_s18  ;;  %p1632_p13 = scmp.lt.s32.totalorder %s214_s8, %s214_s8 }
  0x66   : > { %p1633_p8 = scmp.lt.s32.totalorder %s1624_s18, %s1624_s18 }
  0x67   : > { %p1627_p0 = pnand %p1625_p7, %p2224_p9 }
  0x68   : > { %p1634_p4 = por %p1633_p8, %p1632_p13 }
  0x69   : > { %p1628_p6 = pneg %p1627_p0 }
  0x6b   : > { %p1635_p11 = pnand %p1634_p4, %p1628_p6 }
  0x6d   : > { %1638 = shalt.err (!%p1635_p11)
}
  0x6e   : > { %s2225_s0 = smov 4   ;;  %s2226_s14 = smov 64  }
  0x6f   : > { %1433 = dma.hbm_to_vmem [thread:$0]  (!%p1881_p2), %s2184_s1, 1024, %s214_s8, [#allocation6], %s2226_s14, %s2226_s14, %s2225_s0  }
  0x70   : > { %s1374_s25 = sshll.u32 %s1755_s22, 7  ;;  %s255_s16 = scalar_lea.vmem [#allocation8], %s1277_s13 }
  0x71   : > { %s263_s27 = sshll.u32 %s255_s16, 4  ;;  %s261_s15 = scalar_lea.hbm %s2187_s4, %s1374_s25  ;;  %s264_s27 = int_to_ptr.vmem [resolvable:$true] %s263_s27 }
  0x72   : > { %s1639_s17 = scalar_lea.hbm %s261_s15, 128  ;;  %p2227_p8 = scmp.ne.s32.totalorder %s2217_s10, 0 }
  0x73   : > { %p1640_p4 = scmp.ne.s32.totalorder %s261_s15, %s1639_s17  ;;  %s1644_s30 = scalar_lea.hbm %s2187_s4, 256 }
  0x74   : > { %p2228_p12 = pneg %p2227_p8  ;;  %p1645_p2 = scmp.lt.u32.totalorder %s261_s15, %s2187_s4 }
  0x75   : > { %p1646_p5 = scmp.lt.u32.totalorder %s1644_s30, %s1639_s17  ;;  %p1648_p7 = scmp.lt.u32.totalorder %s1639_s17, %s261_s15 }
  0x76   : > { %p1642_p1 = pnand %p1640_p4, %p2228_p12 }
  0x77   : > { %p1647_p3 = por %p1646_p5, %p1645_p2 }
  0x78   : > { %p1643_p10 = pneg %p1642_p1 }
  0x79   : > { %p1649_p9 = por %p1648_p7, %p1647_p3 }
  0x7b   : > { %p1650_p0 = pnand %p1649_p9, %p1643_p10 }
  0x7d   : > { %1653 = shalt.err (!%p1650_p0)
}
  0x7e   : > { %s1654_s13 = scalar_lea.vmem %s264_s27, 128  ;;  %p2229_p13 = pmov %p2228_p12 }
  0x7f   : > { %p1655_p6 = scmp.ne.s32.totalorder %s264_s27, %s1654_s13  ;;  %s1769_s0 = smov [#allocation8]  }
  0x80   : > { %s1659_s14 = sshll.u32 %s1769_s0, 4  ;;  %s1660_s14 = int_to_ptr.vmem [resolvable:$false] %s1659_s14 }
  0x81   : > { %p1657_p11 = pnand %p1655_p6, %p2229_p13  ;;  %s1661_s3 = scalar_lea.vmem %s1660_s14, 256 }
  0x82   : > { %p1662_p12 = scmp.lt.s32.totalorder %s264_s27, %s1660_s14  ;;  %p1663_p1 = scmp.lt.s32.totalorder %s1661_s3, %s1654_s13 }
  0x83   : > { %p1658_p4 = pneg %p1657_p11 }
  0x84   : > { %p1664_p2 = por %p1663_p1, %p1662_p12 }
  0x86   : > { %p1665_p5 = pnand %p1664_p2, %p1658_p4 }
  0x88   : > { %1668 = shalt.err (!%p1665_p5)
}
  0x89   : > { %1440 = dma.hbm_to_vmem [thread:$0]  (!%p2227_p8), %s261_s15, 128, %s264_s27, %s1949_s12  }
  0x8a   : > { %p2230_p10 = scmp.ne.s32.totalorder %s2215_s6, 0 }
  0x8b   : > { %p2231_p3 = scmp.eq.s32.totalorder (!%p2230_p10), %s1838_s24, 0 }
  0x8c   : > { %272 = sbr.rel (%p2230_p10) target bundleno = 691 (0x2b3), region = 40 }
  0x93   : > { %1722 = dma.done.wait (%p2231_p3), [#allocation3], 128   ;;  %p2232_p7 = pmov %p2231_p3 }
  0x94   : > { %p2233_p9 = pmov %p2231_p3 }
  0x95   : > { %1724 = vsyncadd (%p2232_p7), [#allocation3], 4294967168 }
  0x96   : > { %1726 = dma.done.wait (%p2233_p9), [#allocation6], 1024   ;;  %p2234_p0 = pmov %p2231_p3 }
  0x97   : > { %s282_s10 = sand.u32 1, %s1838_s24   ;;  %s2033_s12 = sand.u32 1, %s1743_s19  }
  0x98   : > { %1728 = vsyncadd (%p2234_p0), [#allocation6], 4294966272  ;;  %s1283_s6 = sshll.u32 %s2033_s12, 9  ;;  %s283_s11 = scalar_lea.sflag [#allocation3], %s282_s10 }
  0x99   : > { %s2036_s25 = scalar_lea.vmem [#allocation7], %s1283_s6  ;;  %p2235_p8 = scmp.ne.s32.totalorder %s2210_s28, 0 }
  0x9b   : > { %1730 = dma.done.wait (%p2235_p8), %s283_s11, 8320  }
  0x9c   : > { %1732 = vsyncadd (%p2235_p8), %s283_s11, 4294958976  ;;  %v1770_v0 = vmov 0.0   ;;  %vm1771_vm0 = vmmov 0   ;;  %v1512_v1 = vld [vmem:[#allocation5] sm:$0xff]   ;;  %v1513_v2 = vld [vmem:[#allocation5 + $0x8] sm:$0xff]   ;;  %s1284_s16 = sshll.u32 %s2033_s12, 3 }
  0x9d   : > { %1393 = vmatprep.subr.bf16.mxu0 %v1770_v0  ;;  %1409 = vmatprep.mubr.msk.bf16.mxu0 %vm1771_vm0, %v1770_v0  ;;  %v1514_v3 = vld [vmem:[#allocation5 + $0x10] sm:$0xff]   ;;  %v456_v4 = vld [vmem:[%s2036_s25] sm:$0xff]  ;;  %v1515_v6 = vld [vmem:[#allocation5 + $0x18] sm:$0xff]   ;;  %s295_s27 = scalar_lea.vmem [#allocation8], %s1284_s16  ;;  %s1285_s26 = sshll.u32 %s2033_s12, 6 }
  0x9e   : > { %1394 = vmatpush3.bf16.msra.mxu0 %v1512_v1  ;;  %v460_v5 = vld [vmem:[%s2036_s25 + $0x20] sm:$0xff]  ;;  %v1517_v20 = vld [vmem:[#allocation5 + $0x28] sm:$0xff]   ;;  %v1518_v25 = vld [vmem:[#allocation5 + $0x30] sm:$0xff]   ;;  %s2117_s7 = scalar_lea.vmem [#allocation9], %s1285_s26  ;;  %s1383_s15 = sshll.u32 %s1751_s21, 9 }
  0x9f   : > { %1395 = vmatprep.subr.bf16.mxu0 %v1770_v0  ;;  %v1297_v7 = vcombine.high %v456_v4, %v460_v5  ;;  %v1296_v8 = vcombine.low %v456_v4, %v460_v5  ;;  %v464_v9 = vld [vmem:[%s2036_s25 + $0x40] sm:$0xff]  ;;  %v457_v29 = vld [vmem:[%s2036_s25 + $0x8] sm:$0xff]  ;;  %v1519_v32 = vld [vmem:[#allocation5 + $0x38] sm:$0xff]   ;;  %s2236_s17 = sld [smem:[#allocation15_spill]]  ;;  %s1143_s9 = sshll.u32 %s2117_s7, 4  ;;  %s2132_s9 = int_to_ptr.vmem [resolvable:$true] %s1143_s9 }
  0xa0   : > { %v468_v10 = vld [vmem:[%s2036_s25 + $0x60] sm:$0xff]  ;;  %v461_v30 = vld [vmem:[%s2036_s25 + $0x28] sm:$0xff]  ;;  %v1520_v37 = vld [vmem:[#allocation2] sm:$0xff]   ;;  %s2237_s18 = sld [smem:[#allocation20_spill]]  ;;  %s1127_s21 = scalar_lea.sflag [#allocation4], %s2033_s12 }
  0xa1   : > { %v1305_v11 = vcombine.high %v464_v9, %v468_v10  ;;  %v472_v12 = vld [vmem:[%s2036_s25 + $0x80] sm:$0xff]  ;;  %882 = vmatprep.subr.bf16.mxu1 %v1297_v7  ;;  %v1304_v14 = vcombine.low %v464_v9, %v468_v10  ;;  %v1299_v34 = vcombine.high %v457_v29, %v461_v30  ;;  %v465_v35 = vld [vmem:[%s2036_s25 + $0x48] sm:$0xff]  ;;  %v1298_v39 = vcombine.low %v457_v29, %v461_v30  ;;  %v458_v10 = vld [vmem:[%s2036_s25 + $0x10] sm:$0xff]  ;;  %s1669_s0 = scalar_lea.vmem %s2132_s9, 1024  ;;  %s1773_s14 = smov [#allocation9]  }
  0xa2   : > { %1396 = vmatpush3.bf16.msra.mxu0 %v1513_v2  ;;  %v476_v13 = vld [vmem:[%s2036_s25 + $0xa0] sm:$0xff]  ;;  %883 = vmatpush1.bf16.msra.mxu1 %v1296_v8  ;;  %v469_v36 = vld [vmem:[%s2036_s25 + $0x68] sm:$0xff]  ;;  %v471_v29 = vld [vmem:[%s2036_s25 + $0x78] sm:$0xff]  ;;  %p1670_p6 = scmp.ne.s32.totalorder %s2132_s9, %s1669_s0  ;;  %s1673_s3 = sshll.u32 %s1773_s14, 4  ;;  %s1674_s3 = int_to_ptr.vmem [resolvable:$false] %s1673_s3 }
  0xa3   : > { %1397 = vmatprep.subr.bf16.mxu0 %v1770_v0  ;;  %v1516_v15 = vld [vmem:[#allocation5 + $0x20] sm:$0xff]   ;;  %884 = vmatprep.subr.bf16.mxu1 %v1305_v11  ;;  %v1313_v16 = vcombine.high %v472_v12, %v476_v13  ;;  %v1312_v19 = vcombine.low %v472_v12, %v476_v13  ;;  %v1307_v40 = vcombine.high %v465_v35, %v469_v36  ;;  %v473_v41 = vld [vmem:[%s2036_s25 + $0x88] sm:$0xff]  ;;  %v462_v11 = vld [vmem:[%s2036_s25 + $0x30] sm:$0xff]  ;;  %s1675_s10 = scalar_lea.vmem %s1674_s3, 2048  ;;  %p1676_p12 = scmp.lt.s32.totalorder %s2132_s9, %s1674_s3 }
  0xa4   : > { %v480_v17 = vld [vmem:[%s2036_s25 + $0xc0] sm:$0xff]  ;;  %v477_v42 = vld [vmem:[%s2036_s25 + $0xa8] sm:$0xff]  ;;  %v1306_v43 = vcombine.low %v465_v35, %v469_v36  ;;  %v459_v12 = vld [vmem:[%s2036_s25 + $0x18] sm:$0xff]  ;;  %v1301_v13 = vcombine.high %v458_v10, %v462_v11  ;;  %p1677_p1 = scmp.lt.s32.totalorder %s1675_s10, %s1669_s0 }
  0xa5   : > { %v484_v18 = vld [vmem:[%s2036_s25 + $0xe0] sm:$0xff]  ;;  %v1315_v44 = vcombine.high %v473_v41, %v477_v42  ;;  %v481_v45 = vld [vmem:[%s2036_s25 + $0xc8] sm:$0xff]  ;;  %v1314_v47 = vcombine.low %v473_v41, %v477_v42  ;;  %v474_v35 = vld [vmem:[%s2036_s25 + $0x90] sm:$0xff]  ;;  %p2239_p13 = scmp.ne.s32.totalorder %s2236_s17, 0 }
  0xa6   : > { %1398 = vmatpush3.bf16.msra.mxu0 %v1514_v3  ;;  %885 = vmatpush1.bf16.msra.mxu1 %v1304_v14  ;;  %v1321_v21 = vcombine.high %v480_v17, %v484_v18  ;;  %v488_v22 = vld [vmem:[%s2036_s25 + $0x100] sm:$0xff]  ;;  %v1320_v24 = vcombine.low %v480_v17, %v484_v18  ;;  %v485_v46 = vld [vmem:[%s2036_s25 + $0xe8] sm:$0xff]  ;;  %v463_v14 = vld [vmem:[%s2036_s25 + $0x38] sm:$0xff]  ;;  %v1772_v18 = vmov 0   ;;  %s2238_s8 = smov %s2237_s18  ;;  %s2130_s13 = scalar_lea.hbm %s2237_s18, %s1383_s15 }
  0xa7   : > { %1399 = vmatprep.subr.bf16.mxu0 %v1770_v0  ;;  %886 = vmatprep.subr.bf16.mxu1 %v1313_v16  ;;  %v492_v23 = vld [vmem:[%s2036_s25 + $0x120] sm:$0xff]  ;;  %v1323_v48 = vcombine.high %v481_v45, %v485_v46  ;;  %v489_v49 = vld [vmem:[%s2036_s25 + $0x108] sm:$0xff]  ;;  %v1322_v51 = vcombine.low %v481_v45, %v485_v46  ;;  %v1302_v16 = vcombine.low %v459_v12, %v463_v14  ;;  %v478_v36 = vld [vmem:[%s2036_s25 + $0xb0] sm:$0xff]  ;;  %p1671_p11 = pnand %p1670_p6, %p2239_p13  ;;  %p1678_p2 = por %p1677_p1, %p1676_p12 }
  0xa8   : > { %v1329_v26 = vcombine.high %v488_v22, %v492_v23  ;;  %v496_v27 = vld [vmem:[%s2036_s25 + $0x140] sm:$0xff]  ;;  %v1328_v31 = vcombine.low %v488_v22, %v492_v23  ;;  %v493_v50 = vld [vmem:[%s2036_s25 + $0x128] sm:$0xff]  ;;  %v1303_v17 = vcombine.high %v459_v12, %v463_v14  ;;  %914 = vmatprep.mubr.bf16.mxu1 %v1772_v18  ;;  %v1317_v41 = vcombine.high %v474_v35, %v478_v36  ;;  %v483_v45 = vld [vmem:[%s2036_s25 + $0xd8] sm:$0xff] }
  0xa9   : > { %v500_v28 = vld [vmem:[%s2036_s25 + $0x160] sm:$0xff]  ;;  %v1331_v52 = vcombine.high %v489_v49, %v493_v50  ;;  %v497_v53 = vld [vmem:[%s2036_s25 + $0x148] sm:$0xff]  ;;  %v1330_v55 = vcombine.low %v489_v49, %v493_v50  ;;  %v487_v46 = vld [vmem:[%s2036_s25 + $0xf8] sm:$0xff]  ;;  %p1672_p4 = pneg %p1671_p11 }
  0xaa   : > { %1400 = vmatpush3.bf16.msra.mxu0 %v1515_v6  ;;  %887 = vmatpush1.bf16.msra.mxu1 %v1312_v19  ;;  %v1337_v33 = vcombine.high %v496_v27, %v500_v28  ;;  %v1336_v38 = vcombine.low %v496_v27, %v500_v28  ;;  %v501_v54 = vld [vmem:[%s2036_s25 + $0x168] sm:$0xff]  ;;  %v504_v58 = vld [vmem:[%s2036_s25 + $0x180] sm:$0xff]  ;;  %v1286_v19 = vld [vmem:[%s2185_s2] ss:$0 sm:$0xff]  ;;  %v1327_v50 = vcombine.high %v483_v45, %v487_v46 }
  0xab   : > { %1401 = vmatprep.subr.bf16.mxu0 %v1770_v0  ;;  %888 = vmatprep.subr.bf16.mxu1 %v1321_v21  ;;  %v1339_v56 = vcombine.high %v497_v53, %v501_v54  ;;  %v1338_v57 = vcombine.low %v497_v53, %v501_v54  ;;  %v508_v59 = vld [vmem:[%s2036_s25 + $0x1a0] sm:$0xff]  ;;  %v505_v60 = vld [vmem:[%s2036_s25 + $0x188] sm:$0xff]  ;;  %v470_v27 = vld [vmem:[%s2036_s25 + $0x70] sm:$0xff]  ;;  %p1679_p5 = pnand %p1678_p2, %p1672_p4 }
  0xac   : > { %v1345_v61 = vcombine.high %v504_v58, %v508_v59  ;;  %v509_v62 = vld [vmem:[%s2036_s25 + $0x1a8] sm:$0xff]  ;;  %v1344_v1 = vcombine.low %v504_v58, %v508_v59  ;;  %v512_v2 = vld [vmem:[%s2036_s25 + $0x1c0] sm:$0xff]  ;;  %v467_v28 = vld [vmem:[%s2036_s25 + $0x58] sm:$0xff] }
  0xad   : > { %v1346_v63 = vcombine.low %v505_v60, %v509_v62  ;;  %v516_v3 = vld [vmem:[%s2036_s25 + $0x1e0] sm:$0xff]  ;;  %v513_v4 = vld [vmem:[%s2036_s25 + $0x1c8] sm:$0xff]  ;;  %v491_v53 = vld [vmem:[%s2036_s25 + $0x118] sm:$0xff] }
  0xae   : > { %1402 = vmatpush3.bf16.msra.mxu0 %v1516_v15  ;;  %889 = vmatpush1.bf16.msra.mxu1 %v1320_v24  ;;  %v1353_v5 = vcombine.high %v512_v2, %v516_v3  ;;  %v517_v6 = vld [vmem:[%s2036_s25 + $0x1e8] sm:$0xff]  ;;  %v1352_v9 = vcombine.low %v512_v2, %v516_v3  ;;  %v1300_v15 = vcombine.low %v458_v10, %v462_v11  ;;  %v495_v54 = vld [vmem:[%s2036_s25 + $0x138] sm:$0xff]  ;;  %v498_v59 = vld [vmem:[%s2036_s25 + $0x150] sm:$0xff] }
  0xaf   : > { %1403 = vmatprep.subr.bf16.mxu0 %v1770_v0  ;;  %890 = vmatprep.subr.bf16.mxu1 %v1329_v26  ;;  %v1354_v7 = vcombine.low %v513_v4, %v517_v6  ;;  %v1355_v8 = vcombine.high %v513_v4, %v517_v6  ;;  %v466_v26 = vld [vmem:[%s2036_s25 + $0x50] sm:$0xff]  ;;  %v1335_v58 = vcombine.high %v491_v53, %v495_v54  ;;  %v511_v6 = vld [vmem:[%s2036_s25 + $0x1b8] sm:$0xff] }
  0xb0   : > { %v506_v3 = vld [vmem:[%s2036_s25 + $0x190] sm:$0xff]  ;;  %v519_v14 = vld [vmem:[%s2036_s25 + $0x1f8] sm:$0xff] }
  0xb1   : > { %v510_v4 = vld [vmem:[%s2036_s25 + $0x1b0] sm:$0xff] }
  0xb2   : > { %1404 = vmatpush3.bf16.msra.mxu0 %v1517_v20  ;;  %891 = vmatpush1.bf16.msra.mxu1 %v1328_v31  ;;  %v514_v11 = vld [vmem:[%s2036_s25 + $0x1d0] sm:$0xff] }
  0xb3   : > { %1405 = vmatprep.subr.bf16.mxu0 %v1770_v0  ;;  %892 = vmatprep.subr.bf16.mxu1 %v1337_v33  ;;  %v1309_v33 = vcombine.high %v466_v26, %v470_v27  ;;  %v518_v12 = vld [vmem:[%s2036_s25 + $0x1f0] sm:$0xff] }
  0xb6   : > { %1406 = vmatpush3.bf16.msra.mxu0 %v1518_v25  ;;  %893 = vmatpush1.bf16.msra.mxu1 %v1336_v38  ;;  %v479_v38 = vld [vmem:[%s2036_s25 + $0xb8] sm:$0xff] }
  0xb7   : > { %1407 = vmatprep.subr.bf16.mxu0 %v1770_v0  ;;  %v1347_v0 = vcombine.high %v505_v60, %v509_v62  ;;  %894 = vmatprep.subr.bf16.mxu1 %v1345_v61  ;;  %v502_v60 = vld [vmem:[%s2036_s25 + $0x170] sm:$0xff]  ;;  %v499_v61 = vld [vmem:[%s2036_s25 + $0x158] sm:$0xff] }
  0xb8   : > { %v503_v62 = vld [vmem:[%s2036_s25 + $0x178] sm:$0xff] }
  0xb9   : > { %v1343_v2 = vcombine.high %v499_v61, %v503_v62 }
  0xba   : > { %1408 = vmatpush3.bf16.msra.mxu0 %v1519_v32  ;;  %895 = vmatpush1.bf16.msra.mxu1 %v1344_v1  ;;  %v1341_v1 = vcombine.high %v498_v59, %v502_v60 }
  0xbb   : > { %925 = vmatprep.subr.bf16.mxu0 %v1299_v34  ;;  %896 = vmatprep.subr.bf16.mxu1 %v1353_v5  ;;  %v1311_v34 = vcombine.high %v467_v28, %v471_v29  ;;  %v507_v5 = vld [vmem:[%s2036_s25 + $0x198] sm:$0xff] }
  0xbc   : > { %v1351_v10 = vcombine.high %v507_v5, %v511_v6 }
  0xbd   : > { %1410 = vmatmul.mubr.bf16.vlgmr.msra.gmra.mrb[0].mxu0 %v1520_v37  ;;  %v475_v37 = vld [vmem:[%s2036_s25 + $0x98] sm:$0xff] }
  0xbe   : > { %926 = vmatpush1.bf16.msra.mxu0 %v1298_v39  ;;  %897 = vmatpush1.bf16.msra.mxu1 %v1352_v9  ;;  %v1308_v39 = vcombine.low %v466_v26, %v470_v27  ;;  %v1319_v42 = vcombine.high %v475_v37, %v479_v38  ;;  %v1349_v9 = vcombine.high %v506_v3, %v510_v4 }
  0xbf   : > { %927 = vmatprep.subr.bf16.mxu0 %v1307_v40  ;;  %957 = vmatprep.mubr.bf16.mxu0 %v1772_v18  ;;  %v1310_v40 = vcombine.low %v467_v28, %v471_v29 }
  0xc0   : > { %968 = vmatprep.subr.bf16.mxu1 %v1301_v13  ;;  %v515_v13 = vld [vmem:[%s2036_s25 + $0x1d8] sm:$0xff] }
  0xc2   : > { %928 = vmatpush1.bf16.msra.mxu0 %v1306_v43  ;;  %v482_v43 = vld [vmem:[%s2036_s25 + $0xd0] sm:$0xff] }
  0xc3   : > { %929 = vmatprep.subr.bf16.mxu0 %v1315_v44  ;;  %v486_v44 = vld [vmem:[%s2036_s25 + $0xf0] sm:$0xff] }
  0xc4   : > { %v1325_v49 = vcombine.high %v482_v43, %v486_v44 }
  0xc6   : > { %930 = vmatpush1.bf16.msra.mxu0 %v1314_v47  ;;  %v1316_v47 = vcombine.low %v474_v35, %v478_v36 }
  0xc7   : > { %931 = vmatprep.subr.bf16.mxu0 %v1323_v48  ;;  %v1318_v48 = vcombine.low %v475_v37, %v479_v38 }
  0xca   : > { %932 = vmatpush1.bf16.msra.mxu0 %v1322_v51  ;;  %v490_v51 = vld [vmem:[%s2036_s25 + $0x110] sm:$0xff] }
  0xcb   : > { %933 = vmatprep.subr.bf16.mxu0 %v1331_v52  ;;  %v494_v52 = vld [vmem:[%s2036_s25 + $0x130] sm:$0xff] }
  0xce   : > { %934 = vmatpush1.bf16.msra.mxu0 %v1330_v55  ;;  %v1324_v55 = vcombine.low %v482_v43, %v486_v44 }
  0xcf   : > { %935 = vmatprep.subr.bf16.mxu0 %v1339_v56  ;;  %v1326_v56 = vcombine.low %v483_v45, %v487_v46 }
  0xd2   : > { %936 = vmatpush1.bf16.msra.mxu0 %v1338_v57  ;;  %v1333_v57 = vcombine.high %v490_v51, %v494_v52 }
  0xd3   : > { %937 = vmatprep.subr.bf16.mxu0 %v1347_v0  ;;  %v1334_v0 = vcombine.low %v491_v53, %v495_v54 }
  0xd6   : > { %938 = vmatpush1.bf16.msra.mxu0 %v1346_v63  ;;  %v1332_v63 = vcombine.low %v490_v51, %v494_v52 }
  0xd7   : > { %939 = vmatprep.subr.bf16.mxu0 %v1355_v8  ;;  %v1342_v8 = vcombine.low %v499_v61, %v503_v62 }
  0xda   : > { %940 = vmatpush1.bf16.msra.mxu0 %v1354_v7  ;;  %v1340_v7 = vcombine.low %v498_v59, %v502_v60 }
  0xdb   : > { %1011 = vmatprep.subr.bf16.mxu0 %v1303_v17  ;;  %v1357_v17 = vcombine.high %v514_v11, %v518_v12 }
 0x190   : > { %v446_v20 = vpop.f32.mrb[0].mxu0 }
 0x191   : > { %v447_v21 = vadd.f32 %v1286_v19, %v446_v20  ;;  %v1411_v22 = vpop.f32.mrb[1].mxu0  ;;  %v1358_v20 = vcombine.low %v515_v13, %v519_v14 }
 0x192   : > { %v449_v23 = vpop.f32.mrb[2].mxu0 }
 0x193   : > { %v450_v24 = vadd.f32 %v1286_v19, %v449_v23  ;;  %v1412_v25 = vpop.f32.mrb[3].mxu0  ;;  %v453_v30 = vmax.f32 %v447_v21, 0.0  ;;  %v1356_v19 = vcombine.low %v514_v11, %v518_v12  ;;  %v522_v21 = vlaneseq }
 0x194   : > { %v520_v25 = vld [vmem:[%s295_s27] sm:$0xff] }
 0x195   : > { %v454_v31 = vmax.f32 %v450_v24, 0.0  ;;  %v523_v22 = vshrl.u32 %v522_v21, 7 }
 0x197   : > { %v2085_v32 = vpack.c.bf16 %v454_v31, %v453_v30  ;;  %v524_v23 = vsub.s32 0, %v523_v22  ;;  %v532_v24 = vsub.s32 2, %v523_v22  ;;  %v528_v26 = vsub.s32 1, %v523_v22 }
 0x198   : > { %v536_v27 = vsub.s32 3, %v523_v22  ;;  %v540_v60 = vsub.s32 4, %v523_v22  ;;  %v548_v61 = vsub.s32 6, %v523_v22  ;;  %v544_v62 = vsub.s32 5, %v523_v22 }
 0x199   : > { %915 = vmatmul.mubr.bf16.vlgmr.msra.gmra.mrb[0].mxu1 %v2085_v32  ;;  %958 = vmatmul.mubr.bf16.vlgmr.msra.gmra.mrb[4].mxu0 %v2085_v32  ;;  %v525_v28 = vrot.slane %v520_v25, %v524_v23  ;;  %v533_v29 = vrot.slane %v520_v25, %v532_v24  ;;  %v529_v30 = vrot.slane %v520_v25, %v528_v26 }
 0x19a   : > { %969 = vmatpush1.bf16.msra.mxu1 %v1300_v15  ;;  %1012 = vmatpush1.bf16.msra.mxu0 %v1302_v16  ;;  %v1348_v15 = vcombine.low %v506_v3, %v510_v4  ;;  %v1350_v16 = vcombine.low %v507_v5, %v511_v6  ;;  %v537_v31 = vrot.slane %v520_v25, %v536_v27 }
 0x19b   : > { %970 = vmatprep.subr.bf16.mxu1 %v1309_v33  ;;  %1013 = vmatprep.subr.bf16.mxu0 %v1311_v34 }
 0x19c   : > { %1000 = vmatprep.mubr.bf16.mxu1 %v1772_v18  ;;  %1043 = vmatprep.mubr.bf16.mxu0 %v1772_v18  ;;  %v1359_v18 = vcombine.high %v515_v13, %v519_v14 }
 0x19e   : > { %971 = vmatpush1.bf16.msra.mxu1 %v1308_v39  ;;  %1014 = vmatpush1.bf16.msra.mxu0 %v1310_v40 }
 0x19f   : > { %972 = vmatprep.subr.bf16.mxu1 %v1317_v41  ;;  %1015 = vmatprep.subr.bf16.mxu0 %v1319_v42 }
 0x1a2   : > { %973 = vmatpush1.bf16.msra.mxu1 %v1316_v47  ;;  %1016 = vmatpush1.bf16.msra.mxu0 %v1318_v48 }
 0x1a3   : > { %974 = vmatprep.subr.bf16.mxu1 %v1325_v49  ;;  %1017 = vmatprep.subr.bf16.mxu0 %v1327_v50 }
 0x1a6   : > { %975 = vmatpush1.bf16.msra.mxu1 %v1324_v55  ;;  %1018 = vmatpush1.bf16.msra.mxu0 %v1326_v56 }
 0x1a7   : > { %976 = vmatprep.subr.bf16.mxu1 %v1333_v57  ;;  %1019 = vmatprep.subr.bf16.mxu0 %v1335_v58 }
 0x1aa   : > { %977 = vmatpush1.bf16.msra.mxu1 %v1332_v63  ;;  %1020 = vmatpush1.bf16.msra.mxu0 %v1334_v0  ;;  %v552_v63 = vsub.s32 7, %v523_v22  ;;  %v541_v0 = vrot.slane %v520_v25, %v540_v60 }
 0x1ab   : > { %978 = vmatprep.subr.bf16.mxu1 %v1341_v1  ;;  %1021 = vmatprep.subr.bf16.mxu0 %v1343_v2  ;;  %v549_v1 = vrot.slane %v520_v25, %v548_v61  ;;  %v545_v2 = vrot.slane %v520_v25, %v544_v62 }
 0x1ac   : > { %v553_v3 = vrot.slane %v520_v25, %v552_v63 }
 0x1ae   : > { %979 = vmatpush1.bf16.msra.mxu1 %v1340_v7  ;;  %1022 = vmatpush1.bf16.msra.mxu0 %v1342_v8 }
 0x1af   : > { %980 = vmatprep.subr.bf16.mxu1 %v1349_v9  ;;  %1023 = vmatprep.subr.bf16.mxu0 %v1351_v10 }
 0x1b2   : > { %981 = vmatpush1.bf16.msra.mxu1 %v1348_v15  ;;  %1024 = vmatpush1.bf16.msra.mxu0 %v1350_v16 }
 0x1b3   : > { %982 = vmatprep.subr.bf16.mxu1 %v1357_v17  ;;  %1025 = vmatprep.subr.bf16.mxu0 %v1359_v18 }
 0x1b6   : > { %983 = vmatpush1.bf16.msra.mxu1 %v1356_v19  ;;  %1026 = vmatpush1.bf16.msra.mxu0 %v1358_v20 }
 0x1b9   : > { %1001 = vmatmul.mubr.bf16.vlgmr.msra.gmra.mrb[4].mxu1 %v2085_v32  ;;  %1044 = vmatmul.mubr.bf16.vlgmr.msra.gmra.mrb[8].mxu0 %v2085_v32 }
 0x26c   : > { %v916_v33 = vpop.f32.mrb[0].mxu1  ;;  %v959_v34 = vpop.f32.mrb[4].mxu0 }
 0x26d   : > { %v917_v35 = vadd.f32 %v916_v33, %v525_v28  ;;  %v960_v36 = vadd.f32 %v959_v34, %v533_v29  ;;  %v918_v37 = vpop.f32.mrb[1].mxu1  ;;  %v961_v38 = vpop.f32.mrb[5].mxu0 }
 0x26e   : > { %v919_v32 = vadd.f32 %v918_v37, %v529_v30  ;;  %v962_v39 = vadd.f32 %v961_v38, %v537_v31  ;;  %v920_v40 = vpop.f32.mrb[2].mxu1  ;;  %v963_v41 = vpop.f32.mrb[6].mxu0 }
 0x26f   : > { %1521 = vtanh.f32 %v917_v35  ;;  %v921_v42 = vadd.f32 %v920_v40, %v525_v28  ;;  %v922_v43 = vpop.f32.mrb[3].mxu1  ;;  %v965_v44 = vpop.f32.mrb[7].mxu0  ;;  %v964_v45 = vadd.f32 %v963_v41, %v533_v29 }
 0x270   : > { %1523 = vtanh.f32 %v960_v36  ;;  %v923_v46 = vadd.f32 %v922_v43, %v529_v30  ;;  %v966_v47 = vadd.f32 %v965_v44, %v537_v31 }
 0x271   : > { %1525 = vtanh.f32 %v919_v32 }
 0x272   : > { %1527 = vtanh.f32 %v962_v39 }
 0x273   : > { %1529 = vtanh.f32 %v921_v42 }
 0x274   : > { %1531 = vtanh.f32 %v964_v45 }
 0x275   : > { %1533 = vtanh.f32 %v923_v46 }
 0x276   : > { %1535 = vtanh.f32 %v966_v47 }
 0x279   : > { %v1522_v48 = vpop.eup %1521 }
 0x27a   : > { %v1524_v49 = vpop.eup %1523 }
 0x27b   : > { %v1526_v50 = vpop.eup %1525 }
 0x27c   : > { %v1528_v51 = vpop.eup %1527  ;;  %v1375_v52 = vpack.c.bf16 %v1526_v50, %v1522_v48 }
 0x27d   : > { %v1530_v53 = vpop.eup %1529  ;;  %v1376_v54 = vpack.c.bf16 %v1528_v51, %v1524_v49 }
 0x27e   : > { %v1532_v55 = vpop.eup %1531  ;;  %1118 = vst [vmem:[%s2117_s7] sm:$0xff] %v1375_v52 }
 0x27f   : > { %v1534_v56 = vpop.eup %1533  ;;  %1119 = vst [vmem:[%s2117_s7 + $0x8] sm:$0xff] %v1376_v54 }
 0x280   : > { %v1536_v57 = vpop.eup %1535  ;;  %v1379_v58 = vpack.c.bf16 %v1534_v56, %v1530_v53 }
 0x281   : > { %v1380_v59 = vpack.c.bf16 %v1536_v57, %v1532_v55 }
 0x282   : > { %1122 = vst [vmem:[%s2117_s7 + $0x20] sm:$0xff] %v1379_v58 }
 0x283   : > { %1123 = vst [vmem:[%s2117_s7 + $0x28] sm:$0xff] %v1380_v59 }
 0x28c   : > { %v1002_v4 = vpop.f32.mrb[4].mxu1  ;;  %v1045_v5 = vpop.f32.mrb[8].mxu0 }
 0x28d   : > { %v1003_v6 = vadd.f32 %v1002_v4, %v541_v0  ;;  %v1046_v7 = vadd.f32 %v1045_v5, %v549_v1  ;;  %v1004_v8 = vpop.f32.mrb[5].mxu1  ;;  %v1047_v9 = vpop.f32.mrb[9].mxu0 }
 0x28e   : > { %v1005_v10 = vadd.f32 %v1004_v8, %v545_v2  ;;  %v1048_v11 = vadd.f32 %v1047_v9, %v553_v3  ;;  %v1006_v12 = vpop.f32.mrb[6].mxu1  ;;  %v1049_v13 = vpop.f32.mrb[10].mxu0 }
 0x28f   : > { %1537 = vtanh.f32 %v1003_v6  ;;  %v1007_v14 = vadd.f32 %v1006_v12, %v541_v0  ;;  %v1008_v15 = vpop.f32.mrb[7].mxu1  ;;  %v1051_v16 = vpop.f32.mrb[11].mxu0  ;;  %v1050_v17 = vadd.f32 %v1049_v13, %v549_v1 }
 0x290   : > { %1539 = vtanh.f32 %v1046_v7  ;;  %v1009_v18 = vadd.f32 %v1008_v15, %v545_v2  ;;  %v1052_v19 = vadd.f32 %v1051_v16, %v553_v3 }
 0x291   : > { %1541 = vtanh.f32 %v1005_v10 }
 0x292   : > { %1543 = vtanh.f32 %v1048_v11 }
 0x293   : > { %1545 = vtanh.f32 %v1007_v14 }
 0x294   : > { %1547 = vtanh.f32 %v1050_v17 }
 0x295   : > { %1549 = vtanh.f32 %v1009_v18 }
 0x296   : > { %1551 = vtanh.f32 %v1052_v19 }
 0x299   : > { %v1538_v20 = vpop.eup %1537 }
 0x29a   : > { %v1540_v21 = vpop.eup %1539 }
 0x29b   : > { %v1542_v22 = vpop.eup %1541 }
 0x29c   : > { %v1544_v23 = vpop.eup %1543  ;;  %v1377_v24 = vpack.c.bf16 %v1542_v22, %v1538_v20 }
 0x29d   : > { %v1546_v25 = vpop.eup %1545  ;;  %v1378_v26 = vpack.c.bf16 %v1544_v23, %v1540_v21 }
 0x29e   : > { %v1548_v27 = vpop.eup %1547  ;;  %1120 = vst [vmem:[%s2117_s7 + $0x10] sm:$0xff] %v1377_v24 }
 0x29f   : > { %v1550_v28 = vpop.eup %1549  ;;  %1121 = vst [vmem:[%s2117_s7 + $0x18] sm:$0xff] %v1378_v26 }
 0x2a0   : > { %v1552_v29 = vpop.eup %1551  ;;  %v1381_v30 = vpack.c.bf16 %v1550_v28, %v1546_v25 }
 0x2a1   : > { %v1382_v31 = vpack.c.bf16 %v1552_v29, %v1548_v27 }
 0x2a2   : > { %1124 = vst [vmem:[%s2117_s7 + $0x30] sm:$0xff] %v1381_v30 }
 0x2a3   : > { %1125 = vst [vmem:[%s2117_s7 + $0x38] sm:$0xff] %v1382_v31 }
 0x2a4   : > { %1682 = shalt.err (!%p1679_p5)
}
 0x2a5   : > { %s1683_s6 = scalar_lea.hbm %s2130_s13, 1024  ;;  %s1687_s24 = scalar_lea.hbm %s2238_s8, 2048 }
 0x2a6   : > { %p1684_p10 = scmp.ne.s32.totalorder %s2130_s13, %s1683_s6  ;;  %p1688_p9 = scmp.lt.u32.totalorder %s2130_s13, %s2238_s8 }
 0x2a7   : > { %p1689_p0 = scmp.lt.u32.totalorder %s1687_s24, %s1683_s6  ;;  %p1691_p6 = scmp.lt.u32.totalorder %s1683_s6, %s2130_s13 }
 0x2a8   : > { %p1685_p3 = pnand %p1684_p10, %p2239_p13 }
 0x2a9   : > { %p1690_p8 = por %p1689_p0, %p1688_p9 }
 0x2aa   : > { %p1686_p7 = pneg %p1685_p3 }
 0x2ab   : > { %p1692_p11 = por %p1691_p6, %p1690_p8 }
 0x2ad   : > { %p1693_p4 = pnand %p1692_p11, %p1686_p7 }
 0x2af   : > { %1696 = shalt.err (!%p1693_p4)
}
 0x2b0   : > { %s1774_s27 = smov 512   ;;  %s1775_s26 = smov 1024  }
 0x2b1   : > { %s1776_s7 = smov 32  }
 0x2b2   : > { %1425 = dma.vmem_to_hbm [thread:$0]  (%p2239_p13), %s2132_s9, 1024, %s2130_s13, %s1127_s21, %s1774_s27, %s1775_s26, %s1776_s7  }
 0x2b3 PF: > { %s2240_s15 = sld [smem:[#allocation14_spill]]  ;;  %s2241_s5 = sld [smem:[#allocation16_spill]] }
 0x2b4   : > { %p2243_p1 = scmp.ge.s32.totalorder %s1759_s23, 2 }
 0x2b9   : > { %s1158_s30 = sand.u32 1, %s2240_s15   ;;  %p2242_p12 = scmp.ne.s32.totalorder %s2241_s5, 0 }
 0x2ba   : > { %s1159_s18 = scalar_lea.sflag [#allocation4], %s1158_s30 }
 0x2bb   : > { %p1442_p2 = pnand %p2243_p1, %p2242_p12 }
 0x2bd   : > { %1734 = dma.done.wait (!%p1442_p2), %s1159_s18, 1024  }
 0x2be   : > { %1736 = vsyncadd (!%p1442_p2), %s1159_s18, 4294966272  ;;  %s20_s23 = sadd.s32 1, %s1759_s23   ;;  %s2244_s12 = sld [smem:[#allocation17_spill]] }
 0x2bf   : > { %p17_p5 = scmp.ge.s32.totalorder %s20_s23, 4   ;;  %s2245_s18 = smov %s1743_s19 }
 0x2c0   : > { %s2246_s19 = smov %s1747_s20  ;;  %s2247_s20 = smov %s1940_s29 }
 0x2c1   : > { %s2248_s21 = smov %s1755_s22  ;;  %19 = sbr.rel (!%p17_p5) target bundleno = 10 (0xa), region = 104 }
 0x2c4   : > { %s2249_s22 = smov %s2244_s12 }
 0x2c8   :  { %1164 = vsyncpa [#allocation3], 1 }
 0x2c9   :  { %1166 = vsyncpa [#allocation3 + $0x1], 1 }
 0x2ca   :  { %1167 = vsyncpa [#allocation6], 1 }
 0x2cb   :  { %1168 = vsyncpa [#allocation4], 1 }
 0x2cc   :  { %1170 = vsyncpa [#allocation4 + $0x1], 1 }

</bundles_post_ra>
